<compile_context>
chip_gen: v6e
topology: v6e:2x2x1
jax: 0.10.0
libtpu: 0.0.40
codegen_flags: <defaults>
</compile_context>

<pallas_src>
import functools

import jax
import jax.numpy as jnp
from jax.experimental import pallas as pl
from jax.experimental.pallas import tpu as pltpu

LN_EPS = 1e-6


# ---------------------------------------------------------------------------
# VMEM budgeting / tiling helpers
# ---------------------------------------------------------------------------

def _vmem_cap_bytes():
    """~75% of physical per-core VMEM (96 MiB v5e/v6e, 48 MiB v7x); safe fallback 48 MiB."""
    try:
        info = pltpu.get_tpu_info()
        phys = int(getattr(info, "vmem_capacity_bytes", 64 << 20))
        if phys <= 0:
            phys = 64 << 20
    except Exception:
        phys = 64 << 20
    return (phys * 3) // 4


_VMEM_CAP = _vmem_cap_bytes()


def _vmem_limit(needed_bytes):
    return int(min(max(int(needed_bytes) + (8 << 20), 32 << 20), _VMEM_CAP))


def _compiler_params(needed_bytes, semantics):
    return pltpu.CompilerParams(
        dimension_semantics=semantics,
        vmem_limit_bytes=_vmem_limit(needed_bytes),
    )


def _row_tile(n, target=256):
    # Full-array block when small (always a legal block shape); otherwise 256, which is
    # sublane-aligned for f32 (8), bf16 (16) and int8 (32).
    return n if n <= target else target


def _head_batch(n_head, cap=4):
    hb = 1
    for c in range(1, min(n_head, cap) + 1):
        if n_head % c == 0:
            hb = c
    return hb


def _pick_hid_chunk(d_in, d_hid, tm, wbytes, budget):
    """d_hid chunk size: resident when it fits, else the largest 128-multiple divisor."""
    def footprint(tk):
        return (2 * (d_in * tk + tk * d_in) * wbytes     # w1/w2 chunks (double-buffered)
                + tm * tk * 4 + tm * d_in * 4            # ReLU intermediate + accumulator
                + 4 * tm * d_in * wbytes)                # x / out row tiles
    if footprint(d_hid) <= budget:
        return d_hid
    for tk in (2048, 1024, 512, 256, 128):
        if tk < d_hid and d_hid % tk == 0 and footprint(tk) <= budget:
            return tk
    return d_hid


# ---------------------------------------------------------------------------
# Kernel bodies
# ---------------------------------------------------------------------------

def _layer_norm_f32(y, gamma, beta):
    mean = jnp.mean(y, axis=-1, keepdims=True)
    var = jnp.mean(jnp.square(y - mean), axis=-1, keepdims=True)
    return (y - mean) * jax.lax.rsqrt(var + LN_EPS) * gamma + beta


def _linear_kernel(x_ref, w_ref, o_ref):
    o_ref[...] = jnp.dot(
        x_ref[...], w_ref[...], preferred_element_type=jnp.float32
    ).astype(o_ref.dtype)


def _proj_residual_ln_kernel(x_ref, w_ref, res_ref, g_ref, b_ref, o_ref):
    # LayerNorm(x @ w + residual)   [fc projection + dropout(identity) + residual + LN]
    y = jnp.dot(x_ref[...], w_ref[...], preferred_element_type=jnp.float32)
    y = y + res_ref[...].astype(jnp.float32)
    y = _layer_norm_f32(y, g_ref[...].astype(jnp.float32), b_ref[...].astype(jnp.float32))
    o_ref[...] = y.astype(o_ref.dtype)


def _ffn_kernel(x_ref, w1_ref, b1_ref, w2_ref, b2_ref, g_ref, be_ref, o_ref, acc_ref):
    # LayerNorm(relu(x @ w1 + b1) @ w2 + b2 + x), with d_hid chunked on grid axis 1.
    k = pl.program_id(1)

    @pl.when(k == 0)
    def _():
        acc_ref[...] = jnp.zeros_like(acc_ref)

    x = x_ref[...]                                                  # native dtype for the MXU
    h = jnp.dot(x, w1_ref[...], preferred_element_type=jnp.float32)
    h = jnp.maximum(h + b1_ref[...].astype(jnp.float32), 0.0)
    acc_ref[...] += jnp.dot(h.astype(w2_ref.dtype), w2_ref[...],
                            preferred_element_type=jnp.float32)

    @pl.when(k == pl.num_programs(1) - 1)
    def _():
        y = acc_ref[...] + b2_ref[...].astype(jnp.float32) + x.astype(jnp.float32)
        y = _layer_norm_f32(y, g_ref[...].astype(jnp.float32),
                            be_ref[...].astype(jnp.float32))
        o_ref[...] = y.astype(o_ref.dtype)


def _softmax_rows(s):
    s = s - jnp.max(s, axis=-1, keepdims=True)
    p = jnp.exp(s)
    return p * pl.reciprocal(jnp.sum(p, axis=-1, keepdims=True), approx=True)


def _attention_kernel_nomask(q_ref, k_ref, v_ref, out_ref, attn_ref, *, inv_temp):
    # q/k/v blocks: (hb, tq, dk) / (hb, Lk, dk) — batched matmuls via einsum.
    q = q_ref[...] * jnp.asarray(inv_temp, q_ref.dtype)
    s = jnp.einsum("hqd,hkd->hqk", q, k_ref[...], preferred_element_type=jnp.float32)
    p = _softmax_rows(s)
    attn_ref[...] = p.astype(attn_ref.dtype)
    out_ref[...] = jnp.einsum("hqk,hkd->hqd", p.astype(v_ref.dtype), v_ref[...],
                              preferred_element_type=jnp.float32).astype(out_ref.dtype)


def _attention_kernel_masked(q_ref, k_ref, v_ref, mask_ref, out_ref, attn_ref, *, inv_temp):
    q = q_ref[...] * jnp.asarray(inv_temp, q_ref.dtype)
    s = jnp.einsum("hqd,hkd->hqk", q, k_ref[...], preferred_element_type=jnp.float32)
    s = jnp.where((mask_ref[...] == 0)[None, :, :], jnp.float32(-1e9), s)
    p = _softmax_rows(s)
    attn_ref[...] = p.astype(attn_ref.dtype)
    out_ref[...] = jnp.einsum("hqk,hkd->hqd", p.astype(v_ref.dtype), v_ref[...],
                              preferred_element_type=jnp.float32).astype(out_ref.dtype)


# ---------------------------------------------------------------------------
# pallas_call wrappers
# ---------------------------------------------------------------------------

def linear(x2, w, *, row_tile=256):
    """x2: [N, Din] @ w: [Din, Dout] -> [N, Dout] (no bias)."""
    n, d_in = x2.shape
    d_out = w.shape[1]
    tm = _row_tile(n, row_tile)
    isize = jnp.dtype(x2.dtype).itemsize
    needed = 2 * (tm * d_in + d_in * d_out + tm * d_out) * isize
    return pl.pallas_call(
        _linear_kernel,
        out_shape=jax.ShapeDtypeStruct((n, d_out), x2.dtype),
        grid_spec=pltpu.PrefetchScalarGridSpec(
            num_scalar_prefetch=0,
            grid=(pl.cdiv(n, tm),),
            in_specs=[pl.BlockSpec((tm, d_in), lambda i: (i, 0)),
                      pl.BlockSpec((d_in, d_out), lambda i: (0, 0))],
            out_specs=pl.BlockSpec((tm, d_out), lambda i: (i, 0))),
        compiler_params=_compiler_params(needed, ("parallel",)),
        cost_estimate=pl.CostEstimate(
            flops=2 * n * d_in * d_out, transcendentals=0,
            bytes_accessed=(n * d_in + d_in * d_out + n * d_out) * isize),
    )(x2, w)


def proj_residual_layernorm(x2, w, res2, gamma, beta, *, row_tile=256):
    """LayerNorm(x2 @ w + res2) with weight gamma / bias beta."""
    n, d_in = x2.shape
    d_out = w.shape[1]
    tm = _row_tile(n, row_tile)
    isize = jnp.dtype(x2.dtype).itemsize
    needed = (2 * (tm * d_in + d_in * d_out + 2 * tm * d_out + 2 * d_out) * isize
              + tm * d_out * 4)
    return pl.pallas_call(
        _proj_residual_ln_kernel,
        out_shape=jax.ShapeDtypeStruct((n, d_out), res2.dtype),
        grid_spec=pltpu.PrefetchScalarGridSpec(
            num_scalar_prefetch=0,
            grid=(pl.cdiv(n, tm),),
            in_specs=[
                pl.BlockSpec((tm, d_in), lambda i: (i, 0)),
                pl.BlockSpec((d_in, d_out), lambda i: (0, 0)),
                pl.BlockSpec((tm, d_out), lambda i: (i, 0)),
                pl.BlockSpec((1, d_out), lambda i: (0, 0)),
                pl.BlockSpec((1, d_out), lambda i: (0, 0)),
            ],
            out_specs=pl.BlockSpec((tm, d_out), lambda i: (i, 0))),
        compiler_params=_compiler_params(needed, ("parallel",)),
        cost_estimate=pl.CostEstimate(
            flops=2 * n * d_in * d_out + 8 * n * d_out,
            transcendentals=n,
            bytes_accessed=(n * d_in + d_in * d_out + 2 * n * d_out) * isize),
    )(x2, w, res2, gamma.reshape(1, d_out), beta.reshape(1, d_out))


def positionwise_feed_forward(x2, w1, b1, w2, b2, gamma, beta, *, row_tile=256):
    """LayerNorm(relu(x2 @ w1 + b1) @ w2 + b2 + x2), d_hid chunked when weights don't fit."""
    n, d_in = x2.shape
    d_hid = w1.shape[1]
    tm = _row_tile(n, row_tile)
    isize = jnp.dtype(x2.dtype).itemsize
    tk = _pick_hid_chunk(d_in, d_hid, tm, isize, int(_VMEM_CAP * 0.8))
    n_chunks = d_hid // tk
    needed = (4 * tm * d_in * isize                       # x / out row tiles (double-buffered)
              + 2 * (d_in * tk + tk * d_in) * isize       # w1 / w2 chunks
              + 2 * (tk + 3 * d_in) * isize               # biases, gamma, beta
              + tm * tk * 4 + tm * d_in * 4)              # ReLU intermediate + accumulator
    return pl.pallas_call(
        _ffn_kernel,
        out_shape=jax.ShapeDtypeStruct((n, d_in), x2.dtype),
        grid_spec=pltpu.PrefetchScalarGridSpec(
            num_scalar_prefetch=0,
            grid=(pl.cdiv(n, tm), n_chunks),
            in_specs=[
                pl.BlockSpec((tm, d_in), lambda i, k: (i, 0)),    # x rows (resident over k)
                pl.BlockSpec((d_in, tk), lambda i, k: (0, k)),    # w1 chunk
                pl.BlockSpec((1, tk), lambda i, k: (0, k)),       # b1 chunk
                pl.BlockSpec((tk, d_in), lambda i, k: (k, 0)),    # w2 chunk
                pl.BlockSpec((1, d_in), lambda i, k: (0, 0)),     # b2
                pl.BlockSpec((1, d_in), lambda i, k: (0, 0)),     # gamma
                pl.BlockSpec((1, d_in), lambda i, k: (0, 0)),     # beta
            ],
            out_specs=pl.BlockSpec((tm, d_in), lambda i, k: (i, 0)),
            scratch_shapes=[pltpu.VMEM((tm, d_in), jnp.float32)]),
        compiler_params=_compiler_params(needed, ("parallel", "arbitrary")),
        cost_estimate=pl.CostEstimate(
            flops=4 * n * d_in * d_hid, transcendentals=0,
            bytes_accessed=(2 * n * d_in + 2 * d_in * d_hid) * isize),
    )(x2, w1, b1.reshape(1, d_hid), w2, b2.reshape(1, d_in),
      gamma.reshape(1, d_in), beta.reshape(1, d_in))


def scaled_dot_product_attention(qh, kh, vh, mask_i8, n_head, temperature):
    """qh/kh/vh: [B*H, S, dk]; mask_i8: [B, Lq, Lk] int8 (0 = masked) or None.
    Returns (out [B*H, Lq, dk], attn [B*H, Lq, Lk] in qh.dtype)."""
    bh, lq, dk = qh.shape
    lk = kh.shape[1]
    hb = _head_batch(n_head)
    tq = _row_tile(lq)
    nq = pl.cdiv(lq, tq)
    inv_temp = 1.0 / float(temperature)
    isize = jnp.dtype(qh.dtype).itemsize

    needed = (2 * hb * tq * dk * isize            # q blocks
              + 4 * hb * lk * dk * isize          # k, v blocks
              + 2 * hb * tq * dk * isize          # out blocks
              + 2 * hb * tq * lk * isize          # attn blocks
              + 2 * hb * tq * lk * 4)             # f32 scores / probs live values
    if mask_i8 is not None:
        needed += 2 * tq * lk                     # int8 mask blocks

    out_shapes = (jax.ShapeDtypeStruct((bh, lq, dk), qh.dtype),
                  jax.ShapeDtypeStruct((bh, lq, lk), qh.dtype))
    out_specs = (pl.BlockSpec((hb, tq, dk), lambda g, qi: (g, qi, 0)),
                 pl.BlockSpec((hb, tq, lk), lambda g, qi: (g, qi, 0)))
    qkv_specs = [
        pl.BlockSpec((hb, tq, dk), lambda g, qi: (g, qi, 0)),
        pl.BlockSpec((hb, lk, dk), lambda g, qi: (g, 0, 0)),   # constant over q tiles
        pl.BlockSpec((hb, lk, dk), lambda g, qi: (g, 0, 0)),
    ]
    cost = pl.CostEstimate(
        flops=4 * bh * lq * lk * dk,
        transcendentals=bh * lq * lk,
        bytes_accessed=(2 * bh * lq * dk + 2 * bh * lk * dk + bh * lq * lk) * isize)

    if mask_i8 is None:
        kernel = functools.partial(_attention_kernel_nomask, inv_temp=inv_temp)
        in_specs = qkv_specs
        args = (qh, kh, vh)
    else:
        kernel = functools.partial(_attention_kernel_masked, inv_temp=inv_temp)
        mask_spec = pl.BlockSpec((None, tq, lk),
                                 lambda g, qi: ((g * hb) // n_head, qi, 0))
        in_specs = qkv_specs + [mask_spec]
        args = (qh, kh, vh, mask_i8)

    return pl.pallas_call(
        kernel,
        out_shape=out_shapes,
        grid_spec=pltpu.PrefetchScalarGridSpec(
            num_scalar_prefetch=0,
            grid=(bh // hb, nq),
            in_specs=in_specs,
            out_specs=out_specs),
        compiler_params=_compiler_params(needed, ("parallel", "parallel")),
        cost_estimate=cost,
    )(*args)


# ---------------------------------------------------------------------------
# EncoderLayer forward
# ---------------------------------------------------------------------------

def prepare_params(params):
    """One-time parameter prep: fuse Q/K/V weights (do NOT redo this per forward call)."""
    p = dict(params)
    if "w_qkv" not in p:
        p["w_qkv"] = jnp.concatenate([p["w_qs"], p["w_ks"], p["w_vs"]], axis=1)
    return p


def _prepare_mask(mask, b, s):
    if mask is None:
        return None
    m = jnp.asarray(mask)
    if m.ndim == 2:            # (Lq, Lk) shared over batch
        m = m[None]
    if m.ndim == 4:            # (B, 1, Lq, Lk) with an explicit head dim
        m = m[:, 0]
    m = jnp.broadcast_to(m, (b, s, s))
    return m.astype(jnp.int8)


def encoder_layer(enc_input, params, slf_attn_mask=None, *, row_tile=256):
    """Forward pass of EncoderLayer (eval mode). Returns (enc_output, attention)."""
    b, s, d_model = enc_input.shape
    n_head = params["n_head"]
    d_k = d_model // n_head
    n = b * s

    params = params if "w_qkv" in params else prepare_params(params)
    x2 = enc_input.reshape(n, d_model)

    # --- MultiHeadAttention -------------------------------------------------
    # Fused Q/K/V projection: a single [d_model, 3*d_model] matmul.
    qkv = linear(x2, params["w_qkv"], row_tile=row_tile)               # [N, 3*d_model]

    # Head split (one XLA transpose for all of Q/K/V).
    qkv_h = (qkv.reshape(b, s, 3, n_head, d_k)
                .transpose(2, 0, 3, 1, 4)
                .reshape(3, b * n_head, s, d_k))
    qh, kh, vh = qkv_h[0], qkv_h[1], qkv_h[2]

    mask_i8 = _prepare_mask(slf_attn_mask, b, s)
    attn_out, attn = scaled_dot_product_attention(
        qh, kh, vh, mask_i8, n_head, temperature=d_k ** 0.5)

    attn_out = (attn_out.reshape(b, n_head, s, d_k)
                        .transpose(0, 2, 1, 3)
                        .reshape(n, d_model))

    # fc projection + dropout(identity) + residual + LayerNorm, fused in one kernel.
    mha_out = proj_residual_layernorm(
        attn_out, params["w_fc"], x2, params["ln1_g"], params["ln1_b"],
        row_tile=row_tile)

    # --- PositionwiseFeedForward ---------------------------------------------
    ffn_out = positionwise_feed_forward(
        mha_out, params["ffn_w1"], params["ffn_b1"], params["ffn_w2"],
        params["ffn_b2"], params["ln2_g"], params["ln2_b"], row_tile=row_tile)

    enc_output = ffn_out.reshape(b, s, d_model)
    attn = attn.reshape(b, n_head, s, s)
    return enc_output, attn


# ---------------------------------------------------------------------------
# Pure-JAX reference (eval-mode semantics of the PyTorch module)
# ---------------------------------------------------------------------------

def _layer_norm_ref(y, gamma, beta):
    mean = jnp.mean(y, axis=-1, keepdims=True)
    var = jnp.mean(jnp.square(y - mean), axis=-1, keepdims=True)
    return (y - mean) / jnp.sqrt(var + LN_EPS) * gamma + beta


def encoder_layer_reference(x, params, mask=None):
    b, s, d_model = x.shape
    n_head = params["n_head"]
    d_k = d_model // n_head
    q = x @ params["w_qs"]
    k = x @ params["w_ks"]
    v = x @ params["w_vs"]

    def split(t):
        return t.reshape(b, s, n_head, d_k).transpose(0, 2, 1, 3)

    qh, kh, vh = split(q), split(k), split(v)
    scores = jnp.einsum("bhqd,bhkd->bhqk", qh / (d_k ** 0.5), kh)
    if mask is not None:
        scores = jnp.where(jnp.asarray(mask)[:, None] == 0, -1e9, scores)
    attn = jax.nn.softmax(scores, axis=-1)
    out = jnp.einsum("bhqk,bhkd->bhqd", attn, vh)
    out = out.transpose(0, 2, 1, 3).reshape(b, s, d_model)
    y = _layer_norm_ref(out @ params["w_fc"] + x, params["ln1_g"], params["ln1_b"])
    h = jnp.maximum(y @ params["ffn_w1"] + params["ffn_b1"], 0.0)
    z = h @ params["ffn_w2"] + params["ffn_b2"] + y
    z = _layer_norm_ref(z, params["ln2_g"], params["ln2_b"])
    return z, attn


# ---------------------------------------------------------------------------
# Demo / correctness check
# ---------------------------------------------------------------------------

if __name__ == "__main__":
    B, S, D_MODEL, N_HEAD, D_INNER = 2, 8, 32, 4, 64

    key = jax.random.PRNGKey(0)
    keys = jax.random.split(key, 9)

    x = jax.random.normal(keys[0], (B, S, D_MODEL), dtype=jnp.float32)

    def init(k, shape, scale=0.1):
        return jax.random.normal(k, shape, dtype=jnp.float32) * scale

    params = {
        "n_head": N_HEAD,
        "w_qs": init(keys[1], (D_MODEL, D_MODEL)),
        "w_ks": init(keys[2], (D_MODEL, D_MODEL)),
        "w_vs": init(keys[3], (D_MODEL, D_MODEL)),
        "w_fc": init(keys[4], (D_MODEL, D_MODEL)),
        "ln1_g": jnp.ones((D_MODEL,), jnp.float32),
        "ln1_b": jnp.zeros((D_MODEL,), jnp.float32),
        "ffn_w1": init(keys[5], (D_MODEL, D_INNER)),
        "ffn_b1": init(keys[6], (D_INNER,)),
        "ffn_w2": init(keys[7], (D_INNER, D_MODEL)),
        "ffn_b2": init(keys[8], (D_MODEL,)),
        "ln2_g": jnp.ones((D_MODEL,), jnp.float32),
        "ln2_b": jnp.zeros((D_MODEL,), jnp.float32),
    }
    params = prepare_params(params)   # one-time Q/K/V weight fusion

    # ---- no-mask path (unmasked kernel variant) ----
    enc_out, attn = encoder_layer(x, params, slf_attn_mask=None)
    enc_out = jax.block_until_ready(enc_out)
    attn = jax.block_until_ready(attn)
    ref_out, ref_attn = encoder_layer_reference(x, params, mask=None)

    assert enc_out.shape == (B, S, D_MODEL)
    assert attn.shape == (B, N_HEAD, S, S)
    assert jnp.allclose(enc_out, ref_out, atol=2e-3, rtol=2e-3), "enc_output mismatch (no mask)"
    assert jnp.allclose(attn, ref_attn, atol=2e-3, rtol=2e-3), "attention mismatch (no mask)"

    # ---- padding-mask path (masked kernel variant, broadcastable [B, 1, S] mask) ----
    lengths = jnp.array([S, 5])
    pad_mask = (jnp.arange(S)[None, None, :] < lengths[:, None, None]).astype(jnp.int32)
    enc_out_m, attn_m = encoder_layer(x, params, slf_attn_mask=pad_mask)
    enc_out_m = jax.block_until_ready(enc_out_m)
    attn_m = jax.block_until_ready(attn_m)
    ref_out_m, ref_attn_m = encoder_layer_reference(x, params, mask=pad_mask)

    assert jnp.allclose(enc_out_m, ref_out_m, atol=2e-3, rtol=2e-3), "enc_output mismatch (mask)"
    assert jnp.allclose(attn_m, ref_attn_m, atol=2e-3, rtol=2e-3), "attention mismatch (mask)"

    print("KERNEL_OK")
</pallas_src>

<mosaic_0001>
module attributes {stable_mosaic.version = 11 : i64} {
  func.func @_linear_kernel(%arg0: i32, %arg1: memref<16x32xf32, #tpu.memory_space<vmem>>, %arg2: memref<32x96xf32, #tpu.memory_space<vmem>>, %arg3: memref<16x96xf32, #tpu.memory_space<vmem>>) attributes {dimension_semantics = [#tpu.dimension_semantics<parallel>], iteration_bounds = array<i64: 1>, scalar_prefetch = 0 : i64, scratch_operands = 0 : i64, tpu.core_type = #tpu.core_type<tc>, window_params = [{transform_indices = @transform_0, window_bounds = array<i64: 16, 32>}, {pipeline_mode = #tpu.pipeline_mode<synchronous>, transform_indices = @transform_1, window_bounds = array<i64: 32, 96>}, {transform_indices = @transform_2, window_bounds = array<i64: 16, 96>}]} {
    %c0 = arith.constant 0 : index
    %c0_0 = arith.constant 0 : index
    %0 = vector.load %arg1[%c0, %c0_0] : memref<16x32xf32, #tpu.memory_space<vmem>>, vector<16x32xf32>
    %c0_1 = arith.constant 0 : index
    %c0_2 = arith.constant 0 : index
    %1 = vector.load %arg2[%c0_1, %c0_2] : memref<32x96xf32, #tpu.memory_space<vmem>>, vector<32x96xf32>
    %cst = arith.constant dense<0.000000e+00> : vector<16x96xf32>
    %2 = tpu.matmul %0, %1, %cst {dimension_numbers = #tpu.dot_dimension_numbers<[1], [0], [0], [1], [0, 0, 1, 1], [], []>} : vector<16x32xf32>, vector<32x96xf32>, vector<16x96xf32> -> vector<16x96xf32>
    %c0_3 = arith.constant 0 : index
    %c0_4 = arith.constant 0 : index
    %3 = vector.load %arg3[%c0_3, %c0_4] : memref<16x96xf32, #tpu.memory_space<vmem>>, vector<16x96xf32>
    tpu.vector_store %arg3[%c0_3, %c0_4], %2 {strides = array<i32>} : memref<16x96xf32, #tpu.memory_space<vmem>>, vector<16x96xf32>,
    return
  }
  func.func @transform_0(%arg0: i32) -> (i32, i32) {
    %c0_i32 = arith.constant 0 : i32
    %c0_i32_0 = arith.constant 0 : i32
    return %arg0, %c0_i32 : i32, i32
  }
  func.func @transform_1(%arg0: i32) -> (i32, i32) {
    %c0_i32 = arith.constant 0 : i32
    %c0_i32_0 = arith.constant 0 : i32
    %c0_i32_1 = arith.constant 0 : i32
    return %c0_i32, %c0_i32_0 : i32, i32
  }
  func.func @transform_2(%arg0: i32) -> (i32, i32) {
    %c0_i32 = arith.constant 0 : i32
    %c0_i32_0 = arith.constant 0 : i32
    return %arg0, %c0_i32 : i32, i32
  }
}

</mosaic_0001>

<bundles_post_ra>
// kernel: tpu_custom_call.1
= control target key start
LH: loop header
LB: loop body
LE: loop exit
PB: predicated region body
PF: predicated region fallthrough
CT: control target
= control target key end

     0   :  { %7 = vsyncpa [#allocation3], 0  ;;  %s279_s0 = inlined_call_operand.hbm [shape: f32[16,32], index: 0, kind: input, shape index: {}]   ;;  %s280_s1 = inlined_call_operand.hbm [shape: f32[32,96], index: 1, kind: input, shape index: {}]   ;;  %s281_s2 = inlined_call_operand.hbm [shape: f32[16,96], index: 2, kind: output, shape index: {}]  }
   0x1   :  { %8 = vsyncpa [#allocation6], 0 }
   0x2   :  { %9 = vsyncpa [#allocation4], 0  ;;  %s239_s9 = smov [#allocation2]  }
   0x3   :  { %s15_s10 = sshll.u32 %s239_s9, 4  ;;  %s16_s10 = int_to_ptr.vmem [resolvable:$true] %s15_s10 }
   0x4   :  { %s181_s11 = scalar_lea.vmem %s16_s10, 256  ;;  %p186_p1 = scmp.lt.s32.totalorder %s16_s10, %s16_s10 }
   0x5   :  { %p182_p0 = scmp.ne.s32.totalorder %s16_s10, %s181_s11  ;;  %p187_p2 = scmp.lt.s32.totalorder %s181_s11, %s181_s11 }
   0x7   :  { %p188_p3 = por %p187_p2, %p186_p1 }
   0x9   :  { %p189_p4 = pnand %p188_p3, %p182_p0 }
   0xb   :  { %192 = shalt.err (!%p189_p4)
}
   0xc   :  { %s240_s12 = smov 128   ;;  %s241_s13 = smov 8  }
   0xd   :  { %21 = dma.hbm_to_vmem [thread:$0]  %s279_s0, 256, %s16_s10, [#allocation3], %s240_s12, %s240_s12, %s241_s13  }
   0xe   :  { %s242_s16 = smov [#allocation5]  }
   0xf   :  { %s27_s17 = sshll.u32 %s242_s16, 4  ;;  %s28_s17 = int_to_ptr.vmem [resolvable:$true] %s27_s17 }
  0x10   :  { %s201_s18 = scalar_lea.vmem %s28_s17, 512  ;;  %p206_p6 = scmp.lt.s32.totalorder %s28_s17, %s28_s17 }
  0x11   :  { %p202_p5 = scmp.ne.s32.totalorder %s28_s17, %s201_s18  ;;  %p207_p7 = scmp.lt.s32.totalorder %s201_s18, %s201_s18 }
  0x13   :  { %p208_p8 = por %p207_p7, %p206_p6 }
  0x15   :  { %p209_p9 = pnand %p208_p8, %p202_p5 }
  0x17   :  { %212 = shalt.err (!%p209_p9)
}
  0x18   :  { %33 = dma.hbm_to_vmem [thread:$0]  %s280_s1, 512, %s28_s17, [#allocation6], %s240_s12, %s240_s12, %s241_s13  }
  0x19   :  { %233 = dma.done.wait [#allocation3], 256  }
  0x1a   :  { %234 = vsyncadd [#allocation3], 4294967040 }
  0x1b   :  { %235 = dma.done.wait [#allocation6], 512  }
  0x1c   :  { %236 = vsyncadd [#allocation6], 4294966784  ;;  %vm46_vm0 = vcmask 261120   ;;  %v45_v0 = vld [vmem:[#allocation5 + $0x18] sm:$0xff]  ;;  %v44_v1 = vld [vmem:[#allocation5 + $0x10] sm:$0xff]  ;;  %vm128_vm1 = vcmask 785408  }
  0x1d   :  { %157 = vmatprep.subr.mxu0 %v45_v0  ;;  %v40_v2 = vld [vmem:[#allocation2] sm:$0xff]  ;;  %v43_v3 = vld [vmem:[#allocation5 + $0x8] sm:$0xff]  ;;  %v42_v4 = vld [vmem:[#allocation5] sm:$0xff]  ;;  %s243_s0 = smov [#allocation7]  }
  0x1e   :  { %158 = vmatpush3.msra.mxu0 %v45_v0  ;;  %165 = vmatprep.mubr.msk.f32.mxu0 %vm46_vm0, %v40_v2  ;;  %v41_v5 = vld [vmem:[#allocation2 + $0x8] sm:$0xff]  ;;  %s136_s1 = sshll.u32 %s243_s0, 4  ;;  %s137_s1 = int_to_ptr.vmem [resolvable:$true] %s136_s1 }
  0x1f   :  { %159 = vmatprep.subr.mxu0 %v44_v1  ;;  %s213_s21 = scalar_lea.vmem %s137_s1, 256  ;;  %p218_p11 = scmp.lt.s32.totalorder %s137_s1, %s137_s1 }
  0x20   :  { %160 = vmatpush3.msra.mxu0 %v44_v1  ;;  %p214_p10 = scmp.ne.s32.totalorder %s137_s1, %s213_s21  ;;  %p219_p12 = scmp.lt.s32.totalorder %s213_s21, %s213_s21 }
  0x21   :  { %161 = vmatprep.subr.mxu0 %v43_v3 }
  0x22   :  { %162 = vmatpush3.msra.mxu0 %v43_v3  ;;  %p220_p13 = por %p219_p12, %p218_p11 }
  0x23   :  { %163 = vmatprep.subr.mxu0 %v42_v4 }
  0x24   :  { %164 = vmatpush3.msra.mxu0 %v42_v4  ;;  %p221_p0 = pnand %p220_p13, %p214_p10 }
  0x25   :  { %166 = vmatmul.mubr.msk.f32.vlgmr.msra.gmra.mxu0 %vm46_vm0, %v41_v5 }
  0xe5   :  { %v167_v6 = vpop.f32.mrf.mxu0 }
  0xe6   :  { %130 = vst.msk [vmem:[#allocation7 + $0x8] sm:$0xff] %vm128_vm1, %v167_v6 }
  0xe7   :  { %v119_v7 = vpop.f32.mrf.mxu0 }
  0xe8   :  { %129 = vst.msk [vmem:[#allocation7] sm:$0xff] %vm128_vm1, %v119_v7 }
  0xe9   :  { %224 = shalt.err (!%p221_p0)
}
  0xea   :  { %142 = dma.vmem_to_hbm [thread:$0]  %s137_s1, 256, %s281_s2, [#allocation4], %s240_s12, %s240_s12, %s241_s13  }
  0xeb   :  { %237 = dma.done.wait [#allocation4], 256  }
  0xec   :  { %238 = vsyncadd [#allocation4], 4294967040 }
  0xed   :  { %146 = vsyncpa [#allocation3], 1 }
  0xee   :  { %147 = vsyncpa [#allocation6], 1 }
  0xef   :  { %148 = vsyncpa [#allocation4], 1 }

</bundles_post_ra>
